<compile_context>
chip_gen: v7x
topology: tpu7x:2x2x1
jax: 0.10.0
libtpu: 0.0.40
codegen_flags: <defaults>
</compile_context>

<pallas_src>
import functools

import jax
import jax.numpy as jnp
from jax.experimental import pallas as pl
from jax.experimental.pallas import tpu as pltpu


LANE = 128            # every feature dim padded to a multiple of 128 lanes
_MIB = 1 << 20


def _round_up(x, m):
    return (x + m - 1) // m * m


# ----------------------------- activations -------------------------------- #
# Mirrors: [tanh, ReLU, CELU, LeakyReLU, ELU, Hardswish, tanh, ReLU, CELU, LeakyReLU, tanh]
def _tanh(x):
    return jnp.tanh(x)


def _relu(x):
    return jnp.maximum(x, 0.0)


def _celu(x, alpha=1.0):
    # exp only sees the (clamped) negative branch -> no wasted EUP work / inf.
    return jnp.maximum(x, 0.0) + jnp.minimum(
        0.0, alpha * (jnp.exp(jnp.minimum(x, 0.0) / alpha) - 1.0))


def _leaky_relu(x, slope=0.01):
    return jnp.where(x >= 0.0, x, slope * x)


def _elu(x, alpha=1.0):
    return jnp.where(x > 0.0, x, alpha * (jnp.exp(jnp.minimum(x, 0.0)) - 1.0))


def _hardswish(x):
    return x * jnp.clip(x + 3.0, 0.0, 6.0) * (1.0 / 6.0)


ACTIVATION_LIST = [
    _tanh, _relu, _celu, _leaky_relu, _elu, _hardswish,
    _tanh, _relu, _celu, _leaky_relu, _tanh,
]
# net_n values whose activation hits the EUP (for the advisory CostEstimate only)
_TRANSCENDENTAL_NETS = {0, 2, 4, 6, 8, 10}


# ------------------------------ fused kernel ------------------------------- #
def _mlp_fused_kernel(*refs, n_layers, act_fn):
    # refs = (x, w_0..w_{L-1}, b_0..b_{L-1}, out)
    # x:   [TILE_B, Kp0]      bf16
    # w_l: [Kp_l, Np_l]       bf16   (per-layer padded, VMEM-resident)
    # b_l: [1,    Np_l]       f32
    # out: [TILE_B, Np_last]  f32
    x_ref = refs[0]
    w_refs = refs[1:1 + n_layers]
    b_refs = refs[1 + n_layers:1 + 2 * n_layers]
    o_ref = refs[1 + 2 * n_layers]

    h = x_ref[...]                                             # bf16 feeds the MXU
    for l in range(n_layers):                                  # static unroll; L is small
        y = jnp.dot(h, w_refs[l][...], preferred_element_type=jnp.float32)
        y = y + b_refs[l][...]                                 # bias + activation in f32
        if l < n_layers - 1:
            h = act_fn(y).astype(jnp.bfloat16)                 # back to bf16 for next matmul
        else:
            o_ref[...] = y.astype(o_ref.dtype)                 # final linear: no activation


# --------------------------- module equivalent ----------------------------- #
def init_mlp_params(key, input_size, hidden_layers, num_classes):
    """Deterministic init matching nn.Linear shapes. Stored as W:[in,out], b:[1,out]."""
    sizes = [input_size] + list(hidden_layers) + [num_classes]
    params = []
    for i in range(len(sizes) - 1):
        key, kw, kb = jax.random.split(key, 3)
        fan_in, fan_out = sizes[i], sizes[i + 1]
        bound = 1.0 / jnp.sqrt(fan_in)
        w = jax.random.uniform(kw, (fan_in, fan_out), jnp.float32, -bound, bound)
        b = jax.random.uniform(kb, (1, fan_out), jnp.float32, -bound, bound)
        params.append((w, b))
    return params


def prepare_mlp_params(params):
    """One-time per weight set: per-layer pad K/N to 128 multiples, cast W to bf16.

    Hoisted out of the per-call path so the forward only pads x and runs the
    kernel.  Zero padding is exact: padded input lanes are 0, padded W rows/cols
    and bias lanes are 0, and every activation in ACTIVATION_LIST maps 0 -> 0.
    """
    w_pads, b_pads, dims = [], [], []
    for w, b in params:
        k, n = w.shape
        kp, np_ = _round_up(k, LANE), _round_up(n, LANE)
        w_pads.append(jnp.pad(w.astype(jnp.bfloat16), ((0, kp - k), (0, np_ - n))))
        b_pads.append(jnp.pad(b.reshape(1, n).astype(jnp.float32), ((0, 0), (0, np_ - n))))
        dims.append((k, n))
    return tuple(w_pads), tuple(b_pads), tuple(dims)


def _pick_tile_b(B):
    # bf16 min sublane tile is 16 rows; large batches use bigger tiles to
    # amortize the ~0.35 us per-grid-step overhead and feed taller MXU operands.
    if B <= 256:
        return max(16, _round_up(B, 16))
    return 256


def mlp_forward(prepared, x, net_n):
    """Fused Pallas implementation of MultiLayerPerceptron_forward.forward."""
    w_pads, b_pads, dims = prepared
    act_fn = ACTIVATION_LIST[net_n]
    n_layers = len(w_pads)
    B, in_features = x.shape
    num_classes = dims[-1][1]

    kp0 = w_pads[0].shape[0]
    np_last = w_pads[-1].shape[1]
    tile_b = _pick_tile_b(B)
    b_pad = _round_up(B, tile_b)
    grid = (b_pad // tile_b,)

    # Pad x directly in bf16 (single pass over the input per call).
    x_pad = jnp.pad(x.astype(jnp.bfloat16),
                    ((0, b_pad - B), (0, kp0 - in_features)))

    # ---- advisory cost estimate + VMEM sizing -----------------------------
    flops = sum(2 * b_pad * w.shape[0] * w.shape[1] for w in w_pads)
    trans = (b_pad * sum(w.shape[1] for w in w_pads[:-1])
             if net_n in _TRANSCENDENTAL_NETS else 0)
    bytes_accessed = (x_pad.size * 2
                      + sum(w.size * 2 for w in w_pads)
                      + sum(b.size * 4 for b in b_pads)
                      + b_pad * np_last * 4)
    cost = pl.CostEstimate(flops=int(flops), transcendentals=int(trans),
                           bytes_accessed=int(bytes_accessed))

    max_np = max(w.shape[1] for w in w_pads)
    resident = sum(w.size * 2 for w in w_pads) + sum(b.size * 4 for b in b_pads)
    need = (resident                          # weights/biases (single-buffered)
            + 2 * tile_b * kp0 * 2            # x tile, double-buffered
            + 2 * tile_b * np_last * 4        # out tile, double-buffered
            + 4 * tile_b * max_np * 4)        # f32/bf16 intermediate headroom
    vmem_limit = int(min(max(2 * need + 2 * _MIB, 32 * _MIB), 64 * _MIB))
    # TODO(synk): if `resident` alone approaches v7x's 64 MiB VMEM, switch the
    # weight specs to a streamed per-layer grid axis instead of full residency.

    def run(single_buffer_weights):
        def const_spec(shape):
            idx = lambda i, _nd=len(shape): (0,) * _nd
            if single_buffer_weights:
                # Constant across grid steps -> one VMEM buffer is enough.
                return pl.BlockSpec(shape, idx, pipeline_mode=pl.Buffered(1))
            return pl.BlockSpec(shape, idx)

        in_specs = ([pl.BlockSpec((tile_b, kp0), lambda i: (i, 0))]      # x: pipelined batch tiles
                    + [const_spec(w.shape) for w in w_pads]              # weights: VMEM-resident
                    + [const_spec(b.shape) for b in b_pads])             # biases:  VMEM-resident
        kernel = functools.partial(_mlp_fused_kernel, n_layers=n_layers, act_fn=act_fn)
        return pl.pallas_call(
            kernel,
            out_shape=jax.ShapeDtypeStruct((b_pad, np_last), jnp.float32),
            grid_spec=pltpu.PrefetchScalarGridSpec(
                num_scalar_prefetch=0,
                grid=grid,
                in_specs=in_specs,
                out_specs=pl.BlockSpec((tile_b, np_last), lambda i: (i, 0)),
            ),
            compiler_params=pltpu.CompilerParams(
                dimension_semantics=("parallel",),     # batch axis: megacore/TC sharding
                vmem_limit_bytes=vmem_limit,
            ),
            cost_estimate=cost,
        )(x_pad, *w_pads, *b_pads)

    try:
        out_pad = run(single_buffer_weights=True)
    except Exception:                                   # pragma: no cover
        out_pad = run(single_buffer_weights=False)      # fallback if Buffered(1) unsupported

    return out_pad[:B, :num_classes]


def mlp_forward_ref(params, x, net_n):
    """Pure-JAX reference mirroring the kernel's precision path (bf16 matmul inputs, f32 acc)."""
    act = ACTIVATION_LIST[net_n]
    n = len(params)
    h = x.astype(jnp.bfloat16).astype(jnp.float32)
    for i, (w, b) in enumerate(params):
        w_b = w.astype(jnp.bfloat16).astype(jnp.float32)
        y = h @ w_b + b.reshape(1, -1)
        if i < n - 1:
            h = act(y).astype(jnp.bfloat16).astype(jnp.float32)
        else:
            h = y
    return h


# ---------------------------------- main ----------------------------------- #
if __name__ == "__main__":
    key = jax.random.PRNGKey(0)
    key, kx = jax.random.split(key)

    batch = 8
    input_size = 32
    hidden_layers = [64, 48]
    num_classes = 16
    net_n = 5  # Hardswish

    x = jax.random.normal(kx, (batch, input_size), jnp.float32)
    params = init_mlp_params(key, input_size, hidden_layers, num_classes)
    prepared = prepare_mlp_params(params)   # hoisted: padding/bf16 cast done once, not per call

    out = mlp_forward(prepared, x, net_n)
    out = jax.block_until_ready(out)

    ref = mlp_forward_ref(params, x, net_n)
    assert out.shape == (batch, num_classes)
    assert jnp.allclose(out, ref, atol=5e-3, rtol=5e-3), (
        float(jnp.max(jnp.abs(out - ref))))

    print("KERNEL_OK")
</pallas_src>

<mosaic_0001>
module attributes {stable_mosaic.version = 11 : i64} {
  func.func @_mlp_fused_kernel(%arg0: i32, %arg1: memref<16x128xbf16, #tpu.memory_space<vmem>>, %arg2: memref<128x128xbf16, #tpu.memory_space<vmem>>, %arg3: memref<128x128xbf16, #tpu.memory_space<vmem>>, %arg4: memref<128x128xbf16, #tpu.memory_space<vmem>>, %arg5: memref<1x128xf32, #tpu.memory_space<vmem>>, %arg6: memref<1x128xf32, #tpu.memory_space<vmem>>, %arg7: memref<1x128xf32, #tpu.memory_space<vmem>>, %arg8: memref<16x128xf32, #tpu.memory_space<vmem>>) attributes {dimension_semantics = [#tpu.dimension_semantics<parallel>], iteration_bounds = array<i64: 1>, scalar_prefetch = 0 : i64, scratch_operands = 0 : i64, tpu.core_type = #tpu.core_type<tc>, window_params = [{transform_indices = @transform_0, window_bounds = array<i64: 16, 128>}, {pipeline_mode = #tpu.pipeline_mode<synchronous>, transform_indices = @transform_1, window_bounds = array<i64: 128, 128>}, {pipeline_mode = #tpu.pipeline_mode<synchronous>, transform_indices = @transform_2, window_bounds = array<i64: 128, 128>}, {pipeline_mode = #tpu.pipeline_mode<synchronous>, transform_indices = @transform_3, window_bounds = array<i64: 128, 128>}, {pipeline_mode = #tpu.pipeline_mode<synchronous>, transform_indices = @transform_4, window_bounds = array<i64: 1, 128>}, {pipeline_mode = #tpu.pipeline_mode<synchronous>, transform_indices = @transform_5, window_bounds = array<i64: 1, 128>}, {pipeline_mode = #tpu.pipeline_mode<synchronous>, transform_indices = @transform_6, window_bounds = array<i64: 1, 128>}, {transform_indices = @transform_7, window_bounds = array<i64: 16, 128>}]} {
    %c0 = arith.constant 0 : index
    %c0_0 = arith.constant 0 : index
    %0 = vector.load %arg1[%c0, %c0_0] : memref<16x128xbf16, #tpu.memory_space<vmem>>, vector<16x128xbf16>
    %c0_1 = arith.constant 0 : index
    %c0_2 = arith.constant 0 : index
    %1 = vector.load %arg2[%c0_1, %c0_2] : memref<128x128xbf16, #tpu.memory_space<vmem>>, vector<128x128xbf16>
    %cst = arith.constant dense<0.000000e+00> : vector<16x128xf32>
    %2 = tpu.matmul %0, %1, %cst {dimension_numbers = #tpu.dot_dimension_numbers<[1], [0], [0], [1], [0, 0, 1, 1], [], []>} : vector<16x128xbf16>, vector<128x128xbf16>, vector<16x128xf32> -> vector<16x128xf32>
    %c0_3 = arith.constant 0 : index
    %c0_4 = arith.constant 0 : index
    %3 = vector.load %arg5[%c0_3, %c0_4] : memref<1x128xf32, #tpu.memory_space<vmem>>, vector<1x128xf32>
    %4 = vector.broadcast %3 : vector<1x128xf32> to vector<16x128xf32>
    %5 = arith.addf %2, %4 : vector<16x128xf32>
    %cst_5 = arith.constant 3.000000e+00 : f32
    %6 = vector.broadcast %cst_5 : f32 to vector<16x128xf32>
    %7 = arith.addf %5, %6 : vector<16x128xf32>
    %cst_6 = arith.constant 0.000000e+00 : f32
    %cst_7 = arith.constant 6.000000e+00 : f32
    %8 = vector.broadcast %cst_6 : f32 to vector<16x128xf32>
    %9 = arith.maximumf %8, %7 : vector<16x128xf32>
    %10 = vector.broadcast %cst_7 : f32 to vector<16x128xf32>
    %11 = arith.minimumf %10, %9 : vector<16x128xf32>
    %12 = arith.mulf %5, %11 : vector<16x128xf32>
    %cst_8 = arith.constant 0.166666672 : f32
    %13 = vector.broadcast %cst_8 : f32 to vector<16x128xf32>
    %14 = arith.mulf %12, %13 : vector<16x128xf32>
    %15 = arith.truncf %14 : vector<16x128xf32> to vector<16x128xbf16>
    %c0_9 = arith.constant 0 : index
    %c0_10 = arith.constant 0 : index
    %16 = vector.load %arg3[%c0_9, %c0_10] : memref<128x128xbf16, #tpu.memory_space<vmem>>, vector<128x128xbf16>
    %cst_11 = arith.constant dense<0.000000e+00> : vector<16x128xf32>
    %17 = tpu.matmul %15, %16, %cst_11 {dimension_numbers = #tpu.dot_dimension_numbers<[1], [0], [0], [1], [0, 0, 1, 1], [], []>} : vector<16x128xbf16>, vector<128x128xbf16>, vector<16x128xf32> -> vector<16x128xf32>
    %c0_12 = arith.constant 0 : index
    %c0_13 = arith.constant 0 : index
    %18 = vector.load %arg6[%c0_12, %c0_13] : memref<1x128xf32, #tpu.memory_space<vmem>>, vector<1x128xf32>
    %19 = vector.broadcast %18 : vector<1x128xf32> to vector<16x128xf32>
    %20 = arith.addf %17, %19 : vector<16x128xf32>
    %cst_14 = arith.constant 3.000000e+00 : f32
    %21 = vector.broadcast %cst_14 : f32 to vector<16x128xf32>
    %22 = arith.addf %20, %21 : vector<16x128xf32>
    %cst_15 = arith.constant 0.000000e+00 : f32
    %cst_16 = arith.constant 6.000000e+00 : f32
    %23 = vector.broadcast %cst_15 : f32 to vector<16x128xf32>
    %24 = arith.maximumf %23, %22 : vector<16x128xf32>
    %25 = vector.broadcast %cst_16 : f32 to vector<16x128xf32>
    %26 = arith.minimumf %25, %24 : vector<16x128xf32>
    %27 = arith.mulf %20, %26 : vector<16x128xf32>
    %cst_17 = arith.constant 0.166666672 : f32
    %28 = vector.broadcast %cst_17 : f32 to vector<16x128xf32>
    %29 = arith.mulf %27, %28 : vector<16x128xf32>
    %30 = arith.truncf %29 : vector<16x128xf32> to vector<16x128xbf16>
    %c0_18 = arith.constant 0 : index
    %c0_19 = arith.constant 0 : index
    %31 = vector.load %arg4[%c0_18, %c0_19] : memref<128x128xbf16, #tpu.memory_space<vmem>>, vector<128x128xbf16>
    %cst_20 = arith.constant dense<0.000000e+00> : vector<16x128xf32>
    %32 = tpu.matmul %30, %31, %cst_20 {dimension_numbers = #tpu.dot_dimension_numbers<[1], [0], [0], [1], [0, 0, 1, 1], [], []>} : vector<16x128xbf16>, vector<128x128xbf16>, vector<16x128xf32> -> vector<16x128xf32>
    %c0_21 = arith.constant 0 : index
    %c0_22 = arith.constant 0 : index
    %33 = vector.load %arg7[%c0_21, %c0_22] : memref<1x128xf32, #tpu.memory_space<vmem>>, vector<1x128xf32>
    %34 = vector.broadcast %33 : vector<1x128xf32> to vector<16x128xf32>
    %35 = arith.addf %32, %34 : vector<16x128xf32>
    %c0_23 = arith.constant 0 : index
    %c0_24 = arith.constant 0 : index
    %36 = vector.load %arg8[%c0_23, %c0_24] : memref<16x128xf32, #tpu.memory_space<vmem>>, vector<16x128xf32>
    tpu.vector_store %arg8[%c0_23, %c0_24], %35 {strides = array<i32>} : memref<16x128xf32, #tpu.memory_space<vmem>>, vector<16x128xf32>,
    return
  }
  func.func @transform_0(%arg0: i32) -> (i32, i32) {
    %c0_i32 = arith.constant 0 : i32
    %c0_i32_0 = arith.constant 0 : i32
    return %arg0, %c0_i32 : i32, i32
  }
  func.func @transform_1(%arg0: i32) -> (i32, i32) {
    %c0_i32 = arith.constant 0 : i32
    %c0_i32_0 = arith.constant 0 : i32
    %c0_i32_1 = arith.constant 0 : i32
    return %c0_i32, %c0_i32_0 : i32, i32
  }
  func.func @transform_2(%arg0: i32) -> (i32, i32) {
    %c0_i32 = arith.constant 0 : i32
    %c0_i32_0 = arith.constant 0 : i32
    %c0_i32_1 = arith.constant 0 : i32
    return %c0_i32, %c0_i32_0 : i32, i32
  }
  func.func @transform_3(%arg0: i32) -> (i32, i32) {
    %c0_i32 = arith.constant 0 : i32
    %c0_i32_0 = arith.constant 0 : i32
    %c0_i32_1 = arith.constant 0 : i32
    return %c0_i32, %c0_i32_0 : i32, i32
  }
  func.func @transform_4(%arg0: i32) -> (i32, i32) {
    %c0_i32 = arith.constant 0 : i32
    %c0_i32_0 = arith.constant 0 : i32
    %c0_i32_1 = arith.constant 0 : i32
    return %c0_i32, %c0_i32_0 : i32, i32
  }
  func.func @transform_5(%arg0: i32) -> (i32, i32) {
    %c0_i32 = arith.constant 0 : i32
    %c0_i32_0 = arith.constant 0 : i32
    %c0_i32_1 = arith.constant 0 : i32
    return %c0_i32, %c0_i32_0 : i32, i32
  }
  func.func @transform_6(%arg0: i32) -> (i32, i32) {
    %c0_i32 = arith.constant 0 : i32
    %c0_i32_0 = arith.constant 0 : i32
    %c0_i32_1 = arith.constant 0 : i32
    return %c0_i32, %c0_i32_0 : i32, i32
  }
  func.func @transform_7(%arg0: i32) -> (i32, i32) {
    %c0_i32 = arith.constant 0 : i32
    %c0_i32_0 = arith.constant 0 : i32
    return %arg0, %c0_i32 : i32, i32
  }
}

module attributes {stable_mosaic.version = 11 : i64} {
  func.func @_mlp_fused_kernel(%arg0: i32, %arg1: memref<16x128xbf16, #tpu.memory_space<vmem>>, %arg2: memref<128x128xbf16, #tpu.memory_space<vmem>>, %arg3: memref<128x128xbf16, #tpu.memory_space<vmem>>, %arg4: memref<128x128xbf16, #tpu.memory_space<vmem>>, %arg5: memref<1x128xf32, #tpu.memory_space<vmem>>, %arg6: memref<1x128xf32, #tpu.memory_space<vmem>>, %arg7: memref<1x128xf32, #tpu.memory_space<vmem>>, %arg8: memref<16x128xf32, #tpu.memory_space<vmem>>) attributes {dimension_semantics = [#tpu.dimension_semantics<parallel>], iteration_bounds = array<i64: 1>, scalar_prefetch = 0 : i64, scratch_operands = 0 : i64, tpu.core_type = #tpu.core_type<tc>, window_params = [{transform_indices = @transform_0, window_bounds = array<i64: 16, 128>}, {pipeline_mode = #tpu.pipeline_mode<synchronous>, transform_indices = @transform_1, window_bounds = array<i64: 128, 128>}, {pipeline_mode = #tpu.pipeline_mode<synchronous>, transform_indices = @transform_2, window_bounds = array<i64: 128, 128>}, {pipeline_mode = #tpu.pipeline_mode<synchronous>, transform_indices = @transform_3, window_bounds = array<i64: 128, 128>}, {pipeline_mode = #tpu.pipeline_mode<synchronous>, transform_indices = @transform_4, window_bounds = array<i64: 1, 128>}, {pipeline_mode = #tpu.pipeline_mode<synchronous>, transform_indices = @transform_5, window_bounds = array<i64: 1, 128>}, {pipeline_mode = #tpu.pipeline_mode<synchronous>, transform_indices = @transform_6, window_bounds = array<i64: 1, 128>}, {transform_indices = @transform_7, window_bounds = array<i64: 16, 128>}]} {
    %c0 = arith.constant 0 : index
    %c0_0 = arith.constant 0 : index
    %0 = vector.load %arg1[%c0, %c0_0] : memref<16x128xbf16, #tpu.memory_space<vmem>>, vector<16x128xbf16>
    %c0_1 = arith.constant 0 : index
    %c0_2 = arith.constant 0 : index
    %1 = vector.load %arg2[%c0_1, %c0_2] : memref<128x128xbf16, #tpu.memory_space<vmem>>, vector<128x128xbf16>
    %cst = arith.constant dense<0.000000e+00> : vector<16x128xf32>
    %2 = tpu.matmul %0, %1, %cst {dimension_numbers = #tpu.dot_dimension_numbers<[1], [0], [0], [1], [0, 0, 1, 1], [], []>} : vector<16x128xbf16>, vector<128x128xbf16>, vector<16x128xf32> -> vector<16x128xf32>
    %c0_3 = arith.constant 0 : index
    %c0_4 = arith.constant 0 : index
    %3 = vector.load %arg5[%c0_3, %c0_4] : memref<1x128xf32, #tpu.memory_space<vmem>>, vector<1x128xf32>
    %4 = vector.broadcast %3 : vector<1x128xf32> to vector<16x128xf32>
    %5 = arith.addf %2, %4 : vector<16x128xf32>
    %cst_5 = arith.constant 3.000000e+00 : f32
    %6 = vector.broadcast %cst_5 : f32 to vector<16x128xf32>
    %7 = arith.addf %5, %6 : vector<16x128xf32>
    %cst_6 = arith.constant 0.000000e+00 : f32
    %cst_7 = arith.constant 6.000000e+00 : f32
    %8 = vector.broadcast %cst_6 : f32 to vector<16x128xf32>
    %9 = arith.maximumf %8, %7 : vector<16x128xf32>
    %10 = vector.broadcast %cst_7 : f32 to vector<16x128xf32>
    %11 = arith.minimumf %10, %9 : vector<16x128xf32>
    %12 = arith.mulf %5, %11 : vector<16x128xf32>
    %cst_8 = arith.constant 0.166666672 : f32
    %13 = vector.broadcast %cst_8 : f32 to vector<16x128xf32>
    %14 = arith.mulf %12, %13 : vector<16x128xf32>
    %15 = arith.truncf %14 : vector<16x128xf32> to vector<16x128xbf16>
    %c0_9 = arith.constant 0 : index
    %c0_10 = arith.constant 0 : index
    %16 = vector.load %arg3[%c0_9, %c0_10] : memref<128x128xbf16, #tpu.memory_space<vmem>>, vector<128x128xbf16>
    %cst_11 = arith.constant dense<0.000000e+00> : vector<16x128xf32>
    %17 = tpu.matmul %15, %16, %cst_11 {dimension_numbers = #tpu.dot_dimension_numbers<[1], [0], [0], [1], [0, 0, 1, 1], [], []>} : vector<16x128xbf16>, vector<128x128xbf16>, vector<16x128xf32> -> vector<16x128xf32>
    %c0_12 = arith.constant 0 : index
    %c0_13 = arith.constant 0 : index
    %18 = vector.load %arg6[%c0_12, %c0_13] : memref<1x128xf32, #tpu.memory_space<vmem>>, vector<1x128xf32>
    %19 = vector.broadcast %18 : vector<1x128xf32> to vector<16x128xf32>
    %20 = arith.addf %17, %19 : vector<16x128xf32>
    %cst_14 = arith.constant 3.000000e+00 : f32
    %21 = vector.broadcast %cst_14 : f32 to vector<16x128xf32>
    %22 = arith.addf %20, %21 : vector<16x128xf32>
    %cst_15 = arith.constant 0.000000e+00 : f32
    %cst_16 = arith.constant 6.000000e+00 : f32
    %23 = vector.broadcast %cst_15 : f32 to vector<16x128xf32>
    %24 = arith.maximumf %23, %22 : vector<16x128xf32>
    %25 = vector.broadcast %cst_16 : f32 to vector<16x128xf32>
    %26 = arith.minimumf %25, %24 : vector<16x128xf32>
    %27 = arith.mulf %20, %26 : vector<16x128xf32>
    %cst_17 = arith.constant 0.166666672 : f32
    %28 = vector.broadcast %cst_17 : f32 to vector<16x128xf32>
    %29 = arith.mulf %27, %28 : vector<16x128xf32>
    %30 = arith.truncf %29 : vector<16x128xf32> to vector<16x128xbf16>
    %c0_18 = arith.constant 0 : index
    %c0_19 = arith.constant 0 : index
    %31 = vector.load %arg4[%c0_18, %c0_19] : memref<128x128xbf16, #tpu.memory_space<vmem>>, vector<128x128xbf16>
    %cst_20 = arith.constant dense<0.000000e+00> : vector<16x128xf32>
    %32 = tpu.matmul %30, %31, %cst_20 {dimension_numbers = #tpu.dot_dimension_numbers<[1], [0], [0], [1], [0, 0, 1, 1], [], []>} : vector<16x128xbf16>, vector<128x128xbf16>, vector<16x128xf32> -> vector<16x128xf32>
    %c0_21 = arith.constant 0 : index
    %c0_22 = arith.constant 0 : index
    %33 = vector.load %arg7[%c0_21, %c0_22] : memref<1x128xf32, #tpu.memory_space<vmem>>, vector<1x128xf32>
    %34 = vector.broadcast %33 : vector<1x128xf32> to vector<16x128xf32>
    %35 = arith.addf %32, %34 : vector<16x128xf32>
    %c0_23 = arith.constant 0 : index
    %c0_24 = arith.constant 0 : index
    %36 = vector.load %arg8[%c0_23, %c0_24] : memref<16x128xf32, #tpu.memory_space<vmem>>, vector<16x128xf32>
    tpu.vector_store %arg8[%c0_23, %c0_24], %35 {strides = array<i32>} : memref<16x128xf32, #tpu.memory_space<vmem>>, vector<16x128xf32>,
    return
  }
  func.func @transform_0(%arg0: i32) -> (i32, i32) {
    %c0_i32 = arith.constant 0 : i32
    %c0_i32_0 = arith.constant 0 : i32
    return %arg0, %c0_i32 : i32, i32
  }
  func.func @transform_1(%arg0: i32) -> (i32, i32) {
    %c0_i32 = arith.constant 0 : i32
    %c0_i32_0 = arith.constant 0 : i32
    %c0_i32_1 = arith.constant 0 : i32
    return %c0_i32, %c0_i32_0 : i32, i32
  }
  func.func @transform_2(%arg0: i32) -> (i32, i32) {
    %c0_i32 = arith.constant 0 : i32
    %c0_i32_0 = arith.constant 0 : i32
    %c0_i32_1 = arith.constant 0 : i32
    return %c0_i32, %c0_i32_0 : i32, i32
  }
  func.func @transform_3(%arg0: i32) -> (i32, i32) {
    %c0_i32 = arith.constant 0 : i32
    %c0_i32_0 = arith.constant 0 : i32
    %c0_i32_1 = arith.constant 0 : i32
    return %c0_i32, %c0_i32_0 : i32, i32
  }
  func.func @transform_4(%arg0: i32) -> (i32, i32) {
    %c0_i32 = arith.constant 0 : i32
    %c0_i32_0 = arith.constant 0 : i32
    %c0_i32_1 = arith.constant 0 : i32
    return %c0_i32, %c0_i32_0 : i32, i32
  }
  func.func @transform_5(%arg0: i32) -> (i32, i32) {
    %c0_i32 = arith.constant 0 : i32
    %c0_i32_0 = arith.constant 0 : i32
    %c0_i32_1 = arith.constant 0 : i32
    return %c0_i32, %c0_i32_0 : i32, i32
  }
  func.func @transform_6(%arg0: i32) -> (i32, i32) {
    %c0_i32 = arith.constant 0 : i32
    %c0_i32_0 = arith.constant 0 : i32
    %c0_i32_1 = arith.constant 0 : i32
    return %c0_i32, %c0_i32_0 : i32, i32
  }
  func.func @transform_7(%arg0: i32) -> (i32, i32) {
    %c0_i32 = arith.constant 0 : i32
    %c0_i32_0 = arith.constant 0 : i32
    return %arg0, %c0_i32 : i32, i32
  }
}

</mosaic_0001>

<bundles_post_ra>
// kernel: tpu_custom_call.1
= control target key start
LH: loop header
LB: loop body
LE: loop exit
PB: predicated region body
PF: predicated region fallthrough
CT: control target
= control target key end

     0   :  { %12 = vsyncpa [#allocation3], 0  ;;  %s915_s0 = inlined_call_operand.hbm [shape: bf16[16,128], index: 0, kind: input, shape index: {}]   ;;  %s916_s1 = inlined_call_operand.hbm [shape: bf16[128,128], index: 1, kind: input, shape index: {}]   ;;  %s917_s2 = inlined_call_operand.hbm [shape: bf16[128,128], index: 2, kind: input, shape index: {}]   ;;  %s918_s3 = inlined_call_operand.hbm [shape: bf16[128,128], index: 3, kind: input, shape index: {}]   ;;  %s919_s4 = inlined_call_operand.vmem [shape: f32[1,128], index: 4, kind: input, shape index: {}]   ;;  %s920_s5 = inlined_call_operand.vmem [shape: f32[1,128], index: 5, kind: input, shape index: {}]   ;;  %s921_s6 = inlined_call_operand.vmem [shape: f32[1,128], index: 6, kind: input, shape index: {}]   ;;  %s922_s7 = inlined_call_operand.hbm [shape: f32[16,128], index: 7, kind: output, shape index: {}]  }
   0x1   :  { %13 = vsyncpa [#allocation6], 0 }
   0x2   :  { %14 = vsyncpa [#allocation9], 0 }
   0x3   :  { %15 = vsyncpa [#allocation4], 0  ;;  %s739_s24 = smov [#allocation5]   ;;  %s740_s26 = smov [#allocation2]  }
   0x4   :  { %s33_s25 = sshll.u32 %s739_s24, 4  ;;  %s21_s27 = sshll.u32 %s740_s26, 4  ;;  %s34_s25 = int_to_ptr.vmem [resolvable:$true] %s33_s25  ;;  %s790_s27 = int_to_ptr.vmem [resolvable:$true] %s21_s27 }
   0x5   :  { %s621_s30 = scalar_lea.hbm %s916_s1, 1024 }
   0x6   :  { %p622_p0 = scmp.ne.s32.totalorder %s916_s1, %s621_s30  ;;  %p625_p1 = scmp.lt.u32.totalorder %s621_s30, %s916_s1 }
   0x8   :  { %p627_p2 = pnand %p625_p1, %p622_p0 }
   0xa   :  { %630 = shalt.err (!%p627_p2)
}
   0xb   :  { %s631_s12 = scalar_lea.vmem %s34_s25, 1024  ;;  %p636_p4 = scmp.lt.s32.totalorder %s34_s25, %s34_s25 }
   0xc   :  { %p632_p3 = scmp.ne.s32.totalorder %s34_s25, %s631_s12  ;;  %p637_p5 = scmp.lt.s32.totalorder %s631_s12, %s631_s12 }
   0xe   :  { %p638_p6 = por %p637_p5, %p636_p4 }
  0x10   :  { %p639_p7 = pnand %p638_p6, %p632_p3 }
  0x12   :  { %642 = shalt.err (!%p639_p7)
}
  0x13   :  { %s741_s13 = smov 64   ;;  %s742_s14 = smov 4  }
  0x14   :  { %39 = dma.hbm_to_vmem [thread:$0]  %s916_s1, 1024, %s34_s25, [#allocation6], %s741_s13, %s741_s13, %s742_s14  }
  0x15   :  { %s643_s19 = scalar_lea.hbm %s915_s0, 128 }
  0x16   :  { %p644_p8 = scmp.ne.s32.totalorder %s915_s0, %s643_s19  ;;  %p647_p9 = scmp.lt.u32.totalorder %s643_s19, %s915_s0 }
  0x18   :  { %p649_p10 = pnand %p647_p9, %p644_p8 }
  0x1a   :  { %652 = shalt.err (!%p649_p10)
}
  0x1b   :  { %s653_s24 = scalar_lea.vmem %s790_s27, 128  ;;  %p658_p12 = scmp.lt.s32.totalorder %s790_s27, %s790_s27 }
  0x1c   :  { %p654_p11 = scmp.ne.s32.totalorder %s790_s27, %s653_s24  ;;  %p659_p13 = scmp.lt.s32.totalorder %s653_s24, %s653_s24 }
  0x1e   :  { %p660_p0 = por %p659_p13, %p658_p12 }
  0x20   :  { %p661_p1 = pnand %p660_p0, %p654_p11 }
  0x22   :  { %664 = shalt.err (!%p661_p1)
}
  0x23   :  { %27 = dma.hbm_to_vmem [thread:$0]  %s915_s0, 128, %s790_s27, [#allocation3], %s741_s13, %s741_s13, %s742_s14  }
  0x24   :  { %s743_s26 = smov [#allocation7]   ;;  %s744_s29 = smov [#allocation8]  }
  0x25   :  { %s45_s28 = sshll.u32 %s743_s26, 4  ;;  %s57_s30 = sshll.u32 %s744_s29, 4  ;;  %s46_s28 = int_to_ptr.vmem [resolvable:$true] %s45_s28  ;;  %s827_s30 = int_to_ptr.vmem [resolvable:$true] %s57_s30 }
  0x26   :  { %s665_s10 = scalar_lea.hbm %s917_s2, 1024 }
  0x27   :  { %p666_p2 = scmp.ne.s32.totalorder %s917_s2, %s665_s10  ;;  %p669_p3 = scmp.lt.u32.totalorder %s665_s10, %s917_s2 }
  0x29   :  { %p671_p4 = pnand %p669_p3, %p666_p2 }
  0x2b   :  { %674 = shalt.err (!%p671_p4)
}
  0x2c   :  { %s675_s0 = scalar_lea.vmem %s46_s28, 1024  ;;  %p680_p6 = scmp.lt.s32.totalorder %s46_s28, %s46_s28 }
  0x2d   :  { %p676_p5 = scmp.ne.s32.totalorder %s46_s28, %s675_s0  ;;  %p681_p7 = scmp.lt.s32.totalorder %s675_s0, %s675_s0 }
  0x2f   :  { %p682_p8 = por %p681_p7, %p680_p6 }
  0x31   :  { %p683_p9 = pnand %p682_p8, %p676_p5 }
  0x33   :  { %686 = shalt.err (!%p683_p9)
}
  0x34   :  { %51 = dma.hbm_to_vmem [thread:$0]  %s917_s2, 1024, %s46_s28, [#allocation6], %s741_s13, %s741_s13, %s742_s14  }
  0x35   :  { %s687_s20 = scalar_lea.hbm %s918_s3, 1024 }
  0x36   :  { %p688_p10 = scmp.ne.s32.totalorder %s918_s3, %s687_s20  ;;  %p691_p11 = scmp.lt.u32.totalorder %s687_s20, %s918_s3 }
  0x38   :  { %p693_p12 = pnand %p691_p11, %p688_p10 }
  0x3a   :  { %696 = shalt.err (!%p693_p12)
}
  0x3b   :  { %s697_s1 = scalar_lea.vmem %s827_s30, 1024  ;;  %p702_p0 = scmp.lt.s32.totalorder %s827_s30, %s827_s30 }
  0x3c   :  { %p698_p13 = scmp.ne.s32.totalorder %s827_s30, %s697_s1  ;;  %p703_p1 = scmp.lt.s32.totalorder %s697_s1, %s697_s1 }
  0x3e   :  { %p704_p2 = por %p703_p1, %p702_p0 }
  0x40   :  { %p705_p3 = pnand %p704_p2, %p698_p13 }
  0x42   :  { %708 = shalt.err (!%p705_p3)
}
  0x43   :  { %63 = dma.hbm_to_vmem [thread:$0]  %s918_s3, 1024, %s827_s30, [#allocation9], %s741_s13, %s741_s13, %s742_s14  }
  0x44   :  { %731 = dma.done.wait [#allocation3], 128  }
  0x45   :  { %732 = vsyncadd [#allocation3], 4294967168 }
  0x46   :  { %733 = dma.done.wait [#allocation6], 2048  }
  0x47   :  { %734 = vsyncadd [#allocation6], 4294965248 }
  0x48   :  { %735 = dma.done.wait [#allocation9], 1024  }
  0x49   :  { %736 = vsyncadd [#allocation9], 4294966272  ;;  %v745_v0 = vmov 0.0   ;;  %vm746_vm0 = vmmov 0   ;;  %v596_v1 = vld [vmem:[#allocation5] sm:$0xff]   ;;  %v597_v2 = vld [vmem:[#allocation5 + $0x8] sm:$0xff]  }
  0x4a   :  { %525 = vmatprep.subr.bf16.mxu0 %v745_v0  ;;  %541 = vmatprep.mubr.msk.bf16.mxu0 %vm746_vm0, %v745_v0  ;;  %v598_v3 = vld [vmem:[#allocation5 + $0x10] sm:$0xff]   ;;  %v605_v4 = vld [vmem:[#allocation7] sm:$0xff]   ;;  %v599_v5 = vld [vmem:[#allocation5 + $0x18] sm:$0xff]   ;;  %s747_s28 = smov [#allocation10]  }
  0x4b   :  { %545 = vmatprep.subr.bf16.mxu1 %v745_v0  ;;  %561 = vmatprep.mubr.msk.bf16.mxu1 %vm746_vm0, %v745_v0  ;;  %v606_v6 = vld [vmem:[#allocation7 + $0x8] sm:$0xff]   ;;  %v600_v7 = vld [vmem:[#allocation5 + $0x20] sm:$0xff]   ;;  %v607_v8 = vld [vmem:[#allocation7 + $0x10] sm:$0xff]   ;;  %s456_s29 = sshll.u32 %s747_s28, 4  ;;  %s457_s29 = int_to_ptr.vmem [resolvable:$true] %s456_s29 }
  0x4c   :  { %526 = vmatpush3.bf16.msra.mxu0 %v596_v1  ;;  %546 = vmatpush3.bf16.msra.mxu1 %v605_v4  ;;  %v601_v9 = vld [vmem:[#allocation5 + $0x28] sm:$0xff]   ;;  %v608_v10 = vld [vmem:[#allocation7 + $0x18] sm:$0xff]   ;;  %v602_v11 = vld [vmem:[#allocation5 + $0x30] sm:$0xff]   ;;  %s709_s30 = scalar_lea.vmem %s457_s29, 256  ;;  %p714_p5 = scmp.lt.s32.totalorder %s457_s29, %s457_s29 }
  0x4d   :  { %527 = vmatprep.subr.bf16.mxu0 %v745_v0  ;;  %547 = vmatprep.subr.bf16.mxu1 %v745_v0  ;;  %v603_v12 = vld [vmem:[#allocation5 + $0x38] sm:$0xff]   ;;  %v609_v14 = vld [vmem:[#allocation7 + $0x20] sm:$0xff]   ;;  %v610_v15 = vld [vmem:[#allocation7 + $0x28] sm:$0xff]   ;;  %p710_p4 = scmp.ne.s32.totalorder %s457_s29, %s709_s30  ;;  %p715_p6 = scmp.lt.s32.totalorder %s709_s30, %s709_s30 }
  0x4e   :  { %v604_v13 = vld [vmem:[#allocation2] sm:$0xff]   ;;  %v611_v16 = vld [vmem:[#allocation7 + $0x30] sm:$0xff]   ;;  %v613_v18 = vld [vmem:[#allocation8] sm:$0xff]  }
  0x4f   :  { %v612_v17 = vld [vmem:[#allocation7 + $0x38] sm:$0xff]   ;;  %v614_v19 = vld [vmem:[#allocation8 + $0x8] sm:$0xff]   ;;  %v615_v20 = vld [vmem:[#allocation8 + $0x10] sm:$0xff]   ;;  %p716_p7 = por %p715_p6, %p714_p5 }
  0x50   :  { %528 = vmatpush3.bf16.msra.mxu0 %v597_v2  ;;  %548 = vmatpush3.bf16.msra.mxu1 %v606_v6  ;;  %v616_v21 = vld [vmem:[#allocation8 + $0x18] sm:$0xff]   ;;  %v617_v40 = vld [vmem:[#allocation8 + $0x20] sm:$0xff]   ;;  %v618_v41 = vld [vmem:[#allocation8 + $0x28] sm:$0xff]  }
  0x51   :  { %529 = vmatprep.subr.bf16.mxu0 %v745_v0  ;;  %549 = vmatprep.subr.bf16.mxu1 %v745_v0  ;;  %v470_v22 = vld [vmem:[%s919_s4] ss:$0 sm:$0xff]  ;;  %v619_v42 = vld [vmem:[#allocation8 + $0x30] sm:$0xff]   ;;  %p717_p8 = pnand %p716_p7, %p710_p4 }
  0x52   :  { %v620_v43 = vld [vmem:[#allocation8 + $0x38] sm:$0xff]  }
  0x53   :  { %v480_v44 = vld [vmem:[%s920_s5] ss:$0 sm:$0xff] }
  0x54   :  { %530 = vmatpush3.bf16.msra.mxu0 %v598_v3  ;;  %550 = vmatpush3.bf16.msra.mxu1 %v607_v8  ;;  %v489_v62 = vld [vmem:[%s921_s6] ss:$0 sm:$0xff] }
  0x55   :  { %531 = vmatprep.subr.bf16.mxu0 %v745_v0  ;;  %551 = vmatprep.subr.bf16.mxu1 %v745_v0 }
  0x58   :  { %532 = vmatpush3.bf16.msra.mxu0 %v599_v5  ;;  %552 = vmatpush3.bf16.msra.mxu1 %v608_v10 }
  0x59   :  { %533 = vmatprep.subr.bf16.mxu0 %v745_v0  ;;  %553 = vmatprep.subr.bf16.mxu1 %v745_v0 }
  0x5c   :  { %534 = vmatpush3.bf16.msra.mxu0 %v600_v7  ;;  %554 = vmatpush3.bf16.msra.mxu1 %v609_v14 }
  0x5d   :  { %535 = vmatprep.subr.bf16.mxu0 %v745_v0  ;;  %555 = vmatprep.subr.bf16.mxu1 %v745_v0 }
  0x60   :  { %536 = vmatpush3.bf16.msra.mxu0 %v601_v9  ;;  %556 = vmatpush3.bf16.msra.mxu1 %v610_v15 }
  0x61   :  { %537 = vmatprep.subr.bf16.mxu0 %v745_v0  ;;  %557 = vmatprep.subr.bf16.mxu1 %v745_v0 }
  0x64   :  { %538 = vmatpush3.bf16.msra.mxu0 %v602_v11  ;;  %558 = vmatpush3.bf16.msra.mxu1 %v611_v16 }
  0x65   :  { %539 = vmatprep.subr.bf16.mxu0 %v745_v0  ;;  %559 = vmatprep.subr.bf16.mxu1 %v745_v0 }
  0x68   :  { %540 = vmatpush3.bf16.msra.mxu0 %v603_v12  ;;  %560 = vmatpush3.bf16.msra.mxu1 %v612_v17 }
  0x69   :  { %565 = vmatprep.subr.bf16.mxu0 %v745_v0 }
  0x6b   :  { %542 = vmatmul.mubr.bf16.vlgmr.msra.gmra.mrb[0].mxu0 %v604_v13 }
  0x6c   :  { %581 = vmatprep.mubr.msk.bf16.mxu0 %vm746_vm0, %v745_v0  ;;  %566 = vmatpush3.bf16.msra.mxu0 %v613_v18 }
  0x6d   :  { %567 = vmatprep.subr.bf16.mxu0 %v745_v0 }
  0x70   :  { %568 = vmatpush3.bf16.msra.mxu0 %v614_v19 }
  0x71   :  { %569 = vmatprep.subr.bf16.mxu0 %v745_v0 }
  0x74   :  { %570 = vmatpush3.bf16.msra.mxu0 %v615_v20 }
  0x75   :  { %571 = vmatprep.subr.bf16.mxu0 %v745_v0 }
  0x78   :  { %572 = vmatpush3.bf16.msra.mxu0 %v616_v21 }
  0x79   :  { %573 = vmatprep.subr.bf16.mxu0 %v745_v0 }
  0x7c   :  { %574 = vmatpush3.bf16.msra.mxu0 %v617_v40 }
  0x7d   :  { %575 = vmatprep.subr.bf16.mxu0 %v745_v0 }
  0x80   :  { %576 = vmatpush3.bf16.msra.mxu0 %v618_v41 }
  0x81   :  { %577 = vmatprep.subr.bf16.mxu0 %v745_v0 }
  0x84   :  { %578 = vmatpush3.bf16.msra.mxu0 %v619_v42 }
  0x85   :  { %579 = vmatprep.subr.bf16.mxu0 %v745_v0 }
  0x88   :  { %580 = vmatpush3.bf16.msra.mxu0 %v620_v43 }
 0x13e   :  { %v196_v23 = vpop.f32.mrb[0].mxu0 }
 0x13f   :  { %v197_v24 = vadd.f32 %v470_v22, %v196_v23  ;;  %v543_v25 = vpop.f32.mrb[1].mxu0 }
 0x140   :  { %v199_v26 = vpop.f32.mrb[2].mxu0 }
 0x141   :  { %v203_v27 = vadd.f32 3.0, %v197_v24  ;;  %v200_v28 = vadd.f32 %v470_v22, %v199_v26  ;;  %v544_v29 = vpop.f32.mrb[3].mxu0 }
 0x143   :  { %v205_v30 = vmax.f32 %v203_v27, 0.0  ;;  %v204_v31 = vadd.f32 3.0, %v200_v28 }
 0x145   :  { %v207_v32 = vmin.f32 %v205_v30, 6.0  ;;  %v206_v33 = vmax.f32 %v204_v31, 0.0 }
 0x147   :  { %v209_v34 = vmul.f32 %v207_v32, %v197_v24  ;;  %v208_v35 = vmin.f32 %v206_v33, 6.0 }
 0x149   :  { %v210_v36 = vmul.f32 %v208_v35, %v200_v28  ;;  %v211_v37 = vmul.f32 0.16666667, %v209_v34 }
 0x14b   :  { %v212_v38 = vmul.f32 0.16666667, %v210_v36 }
 0x14d   :  { %v213_v39 = vpack.c.bf16 %v212_v38, %v211_v37 }
 0x14f   :  { %562 = vmatmul.mubr.bf16.vlgmr.msra.gmra.mrb[0].mxu1 %v213_v39 }
 0x222   :  { %v319_v45 = vpop.f32.mrb[0].mxu1 }
 0x223   :  { %v320_v46 = vadd.f32 %v480_v44, %v319_v45  ;;  %v563_v47 = vpop.f32.mrb[1].mxu1 }
 0x224   :  { %v322_v48 = vpop.f32.mrb[2].mxu1 }
 0x225   :  { %v326_v49 = vadd.f32 3.0, %v320_v46  ;;  %v323_v50 = vadd.f32 %v480_v44, %v322_v48  ;;  %v564_v51 = vpop.f32.mrb[3].mxu1 }
 0x227   :  { %v328_v52 = vmax.f32 %v326_v49, 0.0  ;;  %v327_v53 = vadd.f32 3.0, %v323_v50 }
 0x229   :  { %v330_v54 = vmin.f32 %v328_v52, 6.0  ;;  %v329_v55 = vmax.f32 %v327_v53, 0.0 }
 0x22b   :  { %v332_v56 = vmul.f32 %v330_v54, %v320_v46  ;;  %v331_v57 = vmin.f32 %v329_v55, 6.0 }
 0x22d   :  { %v333_v58 = vmul.f32 %v331_v57, %v323_v50  ;;  %v334_v59 = vmul.f32 0.16666667, %v332_v56 }
 0x22f   :  { %v335_v60 = vmul.f32 0.16666667, %v333_v58 }
 0x231   :  { %v336_v61 = vpack.c.bf16 %v335_v60, %v334_v59 }
 0x233   :  { %582 = vmatmul.mubr.bf16.vlgmr.msra.gmra.mrb[4].mxu0 %v336_v61 }
 0x306   :  { %v442_v63 = vpop.f32.mrb[4].mxu0 }
 0x307   :  { %v443_v0 = vadd.f32 %v489_v62, %v442_v63  ;;  %v583_v1 = vpop.f32.mrb[5].mxu0 }
 0x308   :  { %v445_v2 = vpop.f32.mrb[6].mxu0 }
 0x309   :  { %449 = vst [vmem:[#allocation10] sm:$0xff] %v443_v0  ;;  %v446_v3 = vadd.f32 %v489_v62, %v445_v2  ;;  %v584_v4 = vpop.f32.mrb[7].mxu0 }
 0x30b   :  { %450 = vst [vmem:[#allocation10 + $0x8] sm:$0xff] %v446_v3 }
 0x30c   :  { %720 = shalt.err (!%p717_p8)
}
 0x30d   :  { %s721_s9 = scalar_lea.hbm %s922_s7, 256 }
 0x30e   :  { %p722_p9 = scmp.ne.s32.totalorder %s922_s7, %s721_s9  ;;  %p725_p10 = scmp.lt.u32.totalorder %s721_s9, %s922_s7 }
 0x310   :  { %p727_p11 = pnand %p725_p10, %p722_p9 }
 0x312   :  { %730 = shalt.err (!%p727_p11)
}
 0x313   :  { %s748_s16 = smov 128   ;;  %s749_s0 = smov 8  }
 0x314   :  { %462 = dma.vmem_to_hbm [thread:$0]  %s457_s29, 256, %s922_s7, [#allocation4], %s748_s16, %s748_s16, %s749_s0  }
 0x315   :  { %737 = dma.done.wait [#allocation4], 256  }
 0x316   :  { %738 = vsyncadd [#allocation4], 4294967040 }
 0x317   :  { %466 = vsyncpa [#allocation3], 1 }
 0x318   :  { %467 = vsyncpa [#allocation6], 1 }
 0x319   :  { %468 = vsyncpa [#allocation9], 1 }
 0x31a   :  { %469 = vsyncpa [#allocation4], 1 }

// kernel: tpu_custom_call.1
= control target key start
LH: loop header
LB: loop body
LE: loop exit
PB: predicated region body
PF: predicated region fallthrough
CT: control target
= control target key end

     0   :  { %12 = vsyncpa [#allocation3], 0  ;;  %s915_s0 = inlined_call_operand.hbm [shape: bf16[16,128], index: 0, kind: input, shape index: {}]   ;;  %s916_s1 = inlined_call_operand.hbm [shape: bf16[128,128], index: 1, kind: input, shape index: {}]   ;;  %s917_s2 = inlined_call_operand.hbm [shape: bf16[128,128], index: 2, kind: input, shape index: {}]   ;;  %s918_s3 = inlined_call_operand.hbm [shape: bf16[128,128], index: 3, kind: input, shape index: {}]   ;;  %s919_s4 = inlined_call_operand.vmem [shape: f32[1,128], index: 4, kind: input, shape index: {}]   ;;  %s920_s5 = inlined_call_operand.vmem [shape: f32[1,128], index: 5, kind: input, shape index: {}]   ;;  %s921_s6 = inlined_call_operand.vmem [shape: f32[1,128], index: 6, kind: input, shape index: {}]   ;;  %s922_s7 = inlined_call_operand.hbm [shape: f32[16,128], index: 7, kind: output, shape index: {}]  }
   0x1   :  { %13 = vsyncpa [#allocation6], 0 }
   0x2   :  { %14 = vsyncpa [#allocation9], 0 }
   0x3   :  { %15 = vsyncpa [#allocation4], 0  ;;  %s739_s24 = smov [#allocation5]   ;;  %s740_s26 = smov [#allocation2]  }
   0x4   :  { %s33_s25 = sshll.u32 %s739_s24, 4  ;;  %s21_s27 = sshll.u32 %s740_s26, 4  ;;  %s34_s25 = int_to_ptr.vmem [resolvable:$true] %s33_s25  ;;  %s790_s27 = int_to_ptr.vmem [resolvable:$true] %s21_s27 }
   0x5   :  { %s621_s30 = scalar_lea.hbm %s916_s1, 1024 }
   0x6   :  { %p622_p0 = scmp.ne.s32.totalorder %s916_s1, %s621_s30  ;;  %p625_p1 = scmp.lt.u32.totalorder %s621_s30, %s916_s1 }
   0x8   :  { %p627_p2 = pnand %p625_p1, %p622_p0 }
   0xa   :  { %630 = shalt.err (!%p627_p2)
}
   0xb   :  { %s631_s12 = scalar_lea.vmem %s34_s25, 1024  ;;  %p636_p4 = scmp.lt.s32.totalorder %s34_s25, %s34_s25 }
   0xc   :  { %p632_p3 = scmp.ne.s32.totalorder %s34_s25, %s631_s12  ;;  %p637_p5 = scmp.lt.s32.totalorder %s631_s12, %s631_s12 }
   0xe   :  { %p638_p6 = por %p637_p5, %p636_p4 }
  0x10   :  { %p639_p7 = pnand %p638_p6, %p632_p3 }
  0x12   :  { %642 = shalt.err (!%p639_p7)
}
  0x13   :  { %s741_s13 = smov 64   ;;  %s742_s14 = smov 4  }
  0x14   :  { %39 = dma.hbm_to_vmem [thread:$0]  %s916_s1, 1024, %s34_s25, [#allocation6], %s741_s13, %s741_s13, %s742_s14  }
  0x15   :  { %s643_s19 = scalar_lea.hbm %s915_s0, 128 }
  0x16   :  { %p644_p8 = scmp.ne.s32.totalorder %s915_s0, %s643_s19  ;;  %p647_p9 = scmp.lt.u32.totalorder %s643_s19, %s915_s0 }
  0x18   :  { %p649_p10 = pnand %p647_p9, %p644_p8 }
  0x1a   :  { %652 = shalt.err (!%p649_p10)
}
  0x1b   :  { %s653_s24 = scalar_lea.vmem %s790_s27, 128  ;;  %p658_p12 = scmp.lt.s32.totalorder %s790_s27, %s790_s27 }
  0x1c   :  { %p654_p11 = scmp.ne.s32.totalorder %s790_s27, %s653_s24  ;;  %p659_p13 = scmp.lt.s32.totalorder %s653_s24, %s653_s24 }
  0x1e   :  { %p660_p0 = por %p659_p13, %p658_p12 }
  0x20   :  { %p661_p1 = pnand %p660_p0, %p654_p11 }
  0x22   :  { %664 = shalt.err (!%p661_p1)
}
  0x23   :  { %27 = dma.hbm_to_vmem [thread:$0]  %s915_s0, 128, %s790_s27, [#allocation3], %s741_s13, %s741_s13, %s742_s14  }
  0x24   :  { %s743_s26 = smov [#allocation7]   ;;  %s744_s29 = smov [#allocation8]  }
  0x25   :  { %s45_s28 = sshll.u32 %s743_s26, 4  ;;  %s57_s30 = sshll.u32 %s744_s29, 4  ;;  %s46_s28 = int_to_ptr.vmem [resolvable:$true] %s45_s28  ;;  %s827_s30 = int_to_ptr.vmem [resolvable:$true] %s57_s30 }
  0x26   :  { %s665_s10 = scalar_lea.hbm %s917_s2, 1024 }
  0x27   :  { %p666_p2 = scmp.ne.s32.totalorder %s917_s2, %s665_s10  ;;  %p669_p3 = scmp.lt.u32.totalorder %s665_s10, %s917_s2 }
  0x29   :  { %p671_p4 = pnand %p669_p3, %p666_p2 }
  0x2b   :  { %674 = shalt.err (!%p671_p4)
}
  0x2c   :  { %s675_s0 = scalar_lea.vmem %s46_s28, 1024  ;;  %p680_p6 = scmp.lt.s32.totalorder %s46_s28, %s46_s28 }
  0x2d   :  { %p676_p5 = scmp.ne.s32.totalorder %s46_s28, %s675_s0  ;;  %p681_p7 = scmp.lt.s32.totalorder %s675_s0, %s675_s0 }
  0x2f   :  { %p682_p8 = por %p681_p7, %p680_p6 }
  0x31   :  { %p683_p9 = pnand %p682_p8, %p676_p5 }
  0x33   :  { %686 = shalt.err (!%p683_p9)
}
  0x34   :  { %51 = dma.hbm_to_vmem [thread:$0]  %s917_s2, 1024, %s46_s28, [#allocation6], %s741_s13, %s741_s13, %s742_s14  }
  0x35   :  { %s687_s20 = scalar_lea.hbm %s918_s3, 1024 }
  0x36   :  { %p688_p10 = scmp.ne.s32.totalorder %s918_s3, %s687_s20  ;;  %p691_p11 = scmp.lt.u32.totalorder %s687_s20, %s918_s3 }
  0x38   :  { %p693_p12 = pnand %p691_p11, %p688_p10 }
  0x3a   :  { %696 = shalt.err (!%p693_p12)
}
  0x3b   :  { %s697_s1 = scalar_lea.vmem %s827_s30, 1024  ;;  %p702_p0 = scmp.lt.s32.totalorder %s827_s30, %s827_s30 }
  0x3c   :  { %p698_p13 = scmp.ne.s32.totalorder %s827_s30, %s697_s1  ;;  %p703_p1 = scmp.lt.s32.totalorder %s697_s1, %s697_s1 }
  0x3e   :  { %p704_p2 = por %p703_p1, %p702_p0 }
  0x40   :  { %p705_p3 = pnand %p704_p2, %p698_p13 }
  0x42   :  { %708 = shalt.err (!%p705_p3)
}
  0x43   :  { %63 = dma.hbm_to_vmem [thread:$0]  %s918_s3, 1024, %s827_s30, [#allocation9], %s741_s13, %s741_s13, %s742_s14  }
  0x44   :  { %731 = dma.done.wait [#allocation3], 128  }
  0x45   :  { %732 = vsyncadd [#allocation3], 4294967168 }
  0x46   :  { %733 = dma.done.wait [#allocation6], 2048  }
  0x47   :  { %734 = vsyncadd [#allocation6], 4294965248 }
  0x48   :  { %735 = dma.done.wait [#allocation9], 1024  }
  0x49   :  { %736 = vsyncadd [#allocation9], 4294966272  ;;  %v745_v0 = vmov 0.0   ;;  %vm746_vm0 = vmmov 0   ;;  %v596_v1 = vld [vmem:[#allocation5] sm:$0xff]   ;;  %v597_v2 = vld [vmem:[#allocation5 + $0x8] sm:$0xff]  }
  0x4a   :  { %525 = vmatprep.subr.bf16.mxu0 %v745_v0  ;;  %541 = vmatprep.mubr.msk.bf16.mxu0 %vm746_vm0, %v745_v0  ;;  %v598_v3 = vld [vmem:[#allocation5 + $0x10] sm:$0xff]   ;;  %v605_v4 = vld [vmem:[#allocation7] sm:$0xff]   ;;  %v599_v5 = vld [vmem:[#allocation5 + $0x18] sm:$0xff]   ;;  %s747_s28 = smov [#allocation10]  }
  0x4b   :  { %545 = vmatprep.subr.bf16.mxu1 %v745_v0  ;;  %561 = vmatprep.mubr.msk.bf16.mxu1 %vm746_vm0, %v745_v0  ;;  %v606_v6 = vld [vmem:[#allocation7 + $0x8] sm:$0xff]   ;;  %v600_v7 = vld [vmem:[#allocation5 + $0x20] sm:$0xff]   ;;  %v607_v8 = vld [vmem:[#allocation7 + $0x10] sm:$0xff]   ;;  %s456_s29 = sshll.u32 %s747_s28, 4  ;;  %s457_s29 = int_to_ptr.vmem [resolvable:$true] %s456_s29 }
  0x4c   :  { %526 = vmatpush3.bf16.msra.mxu0 %v596_v1  ;;  %546 = vmatpush3.bf16.msra.mxu1 %v605_v4  ;;  %v601_v9 = vld [vmem:[#allocation5 + $0x28] sm:$0xff]   ;;  %v608_v10 = vld [vmem:[#allocation7 + $0x18] sm:$0xff]   ;;  %v602_v11 = vld [vmem:[#allocation5 + $0x30] sm:$0xff]   ;;  %s709_s30 = scalar_lea.vmem %s457_s29, 256  ;;  %p714_p5 = scmp.lt.s32.totalorder %s457_s29, %s457_s29 }
  0x4d   :  { %527 = vmatprep.subr.bf16.mxu0 %v745_v0  ;;  %547 = vmatprep.subr.bf16.mxu1 %v745_v0  ;;  %v603_v12 = vld [vmem:[#allocation5 + $0x38] sm:$0xff]   ;;  %v609_v14 = vld [vmem:[#allocation7 + $0x20] sm:$0xff]   ;;  %v610_v15 = vld [vmem:[#allocation7 + $0x28] sm:$0xff]   ;;  %p710_p4 = scmp.ne.s32.totalorder %s457_s29, %s709_s30  ;;  %p715_p6 = scmp.lt.s32.totalorder %s709_s30, %s709_s30 }
  0x4e   :  { %v604_v13 = vld [vmem:[#allocation2] sm:$0xff]   ;;  %v611_v16 = vld [vmem:[#allocation7 + $0x30] sm:$0xff]   ;;  %v613_v18 = vld [vmem:[#allocation8] sm:$0xff]  }
  0x4f   :  { %v612_v17 = vld [vmem:[#allocation7 + $0x38] sm:$0xff]   ;;  %v614_v19 = vld [vmem:[#allocation8 + $0x8] sm:$0xff]   ;;  %v615_v20 = vld [vmem:[#allocation8 + $0x10] sm:$0xff]   ;;  %p716_p7 = por %p715_p6, %p714_p5 }
  0x50   :  { %528 = vmatpush3.bf16.msra.mxu0 %v597_v2  ;;  %548 = vmatpush3.bf16.msra.mxu1 %v606_v6  ;;  %v616_v21 = vld [vmem:[#allocation8 + $0x18] sm:$0xff]   ;;  %v617_v40 = vld [vmem:[#allocation8 + $0x20] sm:$0xff]   ;;  %v618_v41 = vld [vmem:[#allocation8 + $0x28] sm:$0xff]  }
  0x51   :  { %529 = vmatprep.subr.bf16.mxu0 %v745_v0  ;;  %549 = vmatprep.subr.bf16.mxu1 %v745_v0  ;;  %v470_v22 = vld [vmem:[%s919_s4] ss:$0 sm:$0xff]  ;;  %v619_v42 = vld [vmem:[#allocation8 + $0x30] sm:$0xff]   ;;  %p717_p8 = pnand %p716_p7, %p710_p4 }
  0x52   :  { %v620_v43 = vld [vmem:[#allocation8 + $0x38] sm:$0xff]  }
  0x53   :  { %v480_v44 = vld [vmem:[%s920_s5] ss:$0 sm:$0xff] }
  0x54   :  { %530 = vmatpush3.bf16.msra.mxu0 %v598_v3  ;;  %550 = vmatpush3.bf16.msra.mxu1 %v607_v8  ;;  %v489_v62 = vld [vmem:[%s921_s6] ss:$0 sm:$0xff] }
  0x55   :  { %531 = vmatprep.subr.bf16.mxu0 %v745_v0  ;;  %551 = vmatprep.subr.bf16.mxu1 %v745_v0 }
  0x58   :  { %532 = vmatpush3.bf16.msra.mxu0 %v599_v5  ;;  %552 = vmatpush3.bf16.msra.mxu1 %v608_v10 }
  0x59   :  { %533 = vmatprep.subr.bf16.mxu0 %v745_v0  ;;  %553 = vmatprep.subr.bf16.mxu1 %v745_v0 }
  0x5c   :  { %534 = vmatpush3.bf16.msra.mxu0 %v600_v7  ;;  %554 = vmatpush3.bf16.msra.mxu1 %v609_v14 }
  0x5d   :  { %535 = vmatprep.subr.bf16.mxu0 %v745_v0  ;;  %555 = vmatprep.subr.bf16.mxu1 %v745_v0 }
  0x60   :  { %536 = vmatpush3.bf16.msra.mxu0 %v601_v9  ;;  %556 = vmatpush3.bf16.msra.mxu1 %v610_v15 }
  0x61   :  { %537 = vmatprep.subr.bf16.mxu0 %v745_v0  ;;  %557 = vmatprep.subr.bf16.mxu1 %v745_v0 }
  0x64   :  { %538 = vmatpush3.bf16.msra.mxu0 %v602_v11  ;;  %558 = vmatpush3.bf16.msra.mxu1 %v611_v16 }
  0x65   :  { %539 = vmatprep.subr.bf16.mxu0 %v745_v0  ;;  %559 = vmatprep.subr.bf16.mxu1 %v745_v0 }
  0x68   :  { %540 = vmatpush3.bf16.msra.mxu0 %v603_v12  ;;  %560 = vmatpush3.bf16.msra.mxu1 %v612_v17 }
  0x69   :  { %565 = vmatprep.subr.bf16.mxu0 %v745_v0 }
  0x6b   :  { %542 = vmatmul.mubr.bf16.vlgmr.msra.gmra.mrb[0].mxu0 %v604_v13 }
  0x6c   :  { %581 = vmatprep.mubr.msk.bf16.mxu0 %vm746_vm0, %v745_v0  ;;  %566 = vmatpush3.bf16.msra.mxu0 %v613_v18 }
  0x6d   :  { %567 = vmatprep.subr.bf16.mxu0 %v745_v0 }
  0x70   :  { %568 = vmatpush3.bf16.msra.mxu0 %v614_v19 }
  0x71   :  { %569 = vmatprep.subr.bf16.mxu0 %v745_v0 }
  0x74   :  { %570 = vmatpush3.bf16.msra.mxu0 %v615_v20 }
  0x75   :  { %571 = vmatprep.subr.bf16.mxu0 %v745_v0 }
  0x78   :  { %572 = vmatpush3.bf16.msra.mxu0 %v616_v21 }
  0x79   :  { %573 = vmatprep.subr.bf16.mxu0 %v745_v0 }
  0x7c   :  { %574 = vmatpush3.bf16.msra.mxu0 %v617_v40 }
  0x7d   :  { %575 = vmatprep.subr.bf16.mxu0 %v745_v0 }
  0x80   :  { %576 = vmatpush3.bf16.msra.mxu0 %v618_v41 }
  0x81   :  { %577 = vmatprep.subr.bf16.mxu0 %v745_v0 }
  0x84   :  { %578 = vmatpush3.bf16.msra.mxu0 %v619_v42 }
  0x85   :  { %579 = vmatprep.subr.bf16.mxu0 %v745_v0 }
  0x88   :  { %580 = vmatpush3.bf16.msra.mxu0 %v620_v43 }
 0x13e   :  { %v196_v23 = vpop.f32.mrb[0].mxu0 }
 0x13f   :  { %v197_v24 = vadd.f32 %v470_v22, %v196_v23  ;;  %v543_v25 = vpop.f32.mrb[1].mxu0 }
 0x140   :  { %v199_v26 = vpop.f32.mrb[2].mxu0 }
 0x141   :  { %v203_v27 = vadd.f32 3.0, %v197_v24  ;;  %v200_v28 = vadd.f32 %v470_v22, %v199_v26  ;;  %v544_v29 = vpop.f32.mrb[3].mxu0 }
 0x143   :  { %v205_v30 = vmax.f32 %v203_v27, 0.0  ;;  %v204_v31 = vadd.f32 3.0, %v200_v28 }
 0x145   :  { %v207_v32 = vmin.f32 %v205_v30, 6.0  ;;  %v206_v33 = vmax.f32 %v204_v31, 0.0 }
 0x147   :  { %v209_v34 = vmul.f32 %v207_v32, %v197_v24  ;;  %v208_v35 = vmin.f32 %v206_v33, 6.0 }
 0x149   :  { %v210_v36 = vmul.f32 %v208_v35, %v200_v28  ;;  %v211_v37 = vmul.f32 0.16666667, %v209_v34 }
 0x14b   :  { %v212_v38 = vmul.f32 0.16666667, %v210_v36 }
 0x14d   :  { %v213_v39 = vpack.c.bf16 %v212_v38, %v211_v37 }
 0x14f   :  { %562 = vmatmul.mubr.bf16.vlgmr.msra.gmra.mrb[0].mxu1 %v213_v39 }
 0x222   :  { %v319_v45 = vpop.f32.mrb[0].mxu1 }
 0x223   :  { %v320_v46 = vadd.f32 %v480_v44, %v319_v45  ;;  %v563_v47 = vpop.f32.mrb[1].mxu1 }
 0x224   :  { %v322_v48 = vpop.f32.mrb[2].mxu1 }
 0x225   :  { %v326_v49 = vadd.f32 3.0, %v320_v46  ;;  %v323_v50 = vadd.f32 %v480_v44, %v322_v48  ;;  %v564_v51 = vpop.f32.mrb[3].mxu1 }
 0x227   :  { %v328_v52 = vmax.f32 %v326_v49, 0.0  ;;  %v327_v53 = vadd.f32 3.0, %v323_v50 }
 0x229   :  { %v330_v54 = vmin.f32 %v328_v52, 6.0  ;;  %v329_v55 = vmax.f32 %v327_v53, 0.0 }
 0x22b   :  { %v332_v56 = vmul.f32 %v330_v54, %v320_v46  ;;  %v331_v57 = vmin.f32 %v329_v55, 6.0 }
 0x22d   :  { %v333_v58 = vmul.f32 %v331_v57, %v323_v50  ;;  %v334_v59 = vmul.f32 0.16666667, %v332_v56 }
 0x22f   :  { %v335_v60 = vmul.f32 0.16666667, %v333_v58 }
 0x231   :  { %v336_v61 = vpack.c.bf16 %v335_v60, %v334_v59 }
 0x233   :  { %582 = vmatmul.mubr.bf16.vlgmr.msra.gmra.mrb[4].mxu0 %v336_v61 }
 0x306   :  { %v442_v63 = vpop.f32.mrb[4].mxu0 }
 0x307   :  { %v443_v0 = vadd.f32 %v489_v62, %v442_v63  ;;  %v583_v1 = vpop.f32.mrb[5].mxu0 }
 0x308   :  { %v445_v2 = vpop.f32.mrb[6].mxu0 }
 0x309   :  { %449 = vst [vmem:[#allocation10] sm:$0xff] %v443_v0  ;;  %v446_v3 = vadd.f32 %v489_v62, %v445_v2  ;;  %v584_v4 = vpop.f32.mrb[7].mxu0 }
 0x30b   :  { %450 = vst [vmem:[#allocation10 + $0x8] sm:$0xff] %v446_v3 }
 0x30c   :  { %720 = shalt.err (!%p717_p8)
}
 0x30d   :  { %s721_s9 = scalar_lea.hbm %s922_s7, 256 }
 0x30e   :  { %p722_p9 = scmp.ne.s32.totalorder %s922_s7, %s721_s9  ;;  %p725_p10 = scmp.lt.u32.totalorder %s721_s9, %s922_s7 }
 0x310   :  { %p727_p11 = pnand %p725_p10, %p722_p9 }
 0x312   :  { %730 = shalt.err (!%p727_p11)
}
 0x313   :  { %s748_s16 = smov 128   ;;  %s749_s0 = smov 8  }
 0x314   :  { %462 = dma.vmem_to_hbm [thread:$0]  %s457_s29, 256, %s922_s7, [#allocation4], %s748_s16, %s748_s16, %s749_s0  }
 0x315   :  { %737 = dma.done.wait [#allocation4], 256  }
 0x316   :  { %738 = vsyncadd [#allocation4], 4294967040 }
 0x317   :  { %466 = vsyncpa [#allocation3], 1 }
 0x318   :  { %467 = vsyncpa [#allocation6], 1 }
 0x319   :  { %468 = vsyncpa [#allocation9], 1 }
 0x31a   :  { %469 = vsyncpa [#allocation4], 1 }

</bundles_post_ra>
